<compile_context>
chip_gen: v7x
topology: tpu7x:2x2x1
jax: 0.10.0
libtpu: 0.0.40
codegen_flags: <defaults>
</compile_context>

<pallas_src>
import functools

import jax
import jax.numpy as jnp
import numpy as np
from jax.experimental import pallas as pl
from jax.experimental.pallas import tpu as pltpu


def _round_up(x, m):
    return (x + m - 1) // m * m


_ALIGN = 16  # row alignment inside the packed buffer (bf16 sublane packing)


def _layout(state_size, fc1_units, fc2_units):
    """Row layout of the packed parameter buffer (all block starts 16-aligned)."""
    w = max(_round_up(fc1_units, 128), _round_up(fc2_units, 128))  # lane width
    r1 = _round_up(state_size, _ALIGN)   # w1 rows [0, r1); b1 row at r1
    r2 = r1 + _ALIGN                     # w2 rows [r2, r3)
    r3 = r2 + w                          # b2 row
    r4 = r3 + _ALIGN                     # w3 stored as a row [1, fc2]
    r5 = r4 + _ALIGN                     # b3 scalar at [r5, 0]
    rows = r5 + _ALIGN
    return {"w": w, "r1": r1, "r2": r2, "r3": r3, "r4": r4, "r5": r5, "rows": rows}


def _critic_kernel(x_ref, p_ref, o_ref, *, r1, r2, r3, r4, r5):
    f32 = jnp.float32
    x = x_ref[...]                                # [bm, r1] bf16 (zero feature pad)
    w1 = p_ref[0:r1, :]                           # [r1, W] bf16 (zero-padded)
    b1 = p_ref[r1:r1 + 1, :].astype(f32)          # [1, W]
    w2 = p_ref[r2:r3, :]                          # [W, W]
    b2 = p_ref[r3:r3 + 1, :].astype(f32)          # [1, W]
    w3 = p_ref[r4:r4 + 1, :].astype(f32)          # [1, W] (fc3 weight as a row)
    b3 = p_ref[r5:r5 + 1, 0:1].astype(f32)        # [1, 1]

    # bf16 MXU matmuls with f32 accumulation; zero padding is inert through ReLU.
    h1 = jnp.maximum(jnp.dot(x, w1, preferred_element_type=f32) + b1, 0.0)
    h2 = jnp.maximum(
        jnp.dot(h1.astype(jnp.bfloat16), w2, preferred_element_type=f32) + b2, 0.0)

    # fc3 as VPU multiply + lane reduction (avoids an N=1 MXU matmul).
    out_col = jnp.sum(h2 * w3, axis=-1, keepdims=True) + b3        # [bm, 1] f32
    # Relayout to a lane-dense row so the output block stores/DMAs unmasked.
    o_ref[...] = out_col.reshape(o_ref.shape).astype(o_ref.dtype)  # [1, 1, bm]


def pack_params(params, state_size, fc1_units, fc2_units):
    """Pack w1,b1,w2,b2,w3,b3 into one lane-dense bf16 buffer (one DMA)."""
    lay = _layout(state_size, fc1_units, fc2_units)
    buf = jnp.zeros((lay["rows"], lay["w"]), jnp.float32)
    buf = buf.at[0:state_size, 0:fc1_units].set(params["w1"])
    buf = buf.at[lay["r1"], 0:fc1_units].set(params["b1"].reshape(-1))
    buf = buf.at[lay["r2"]:lay["r2"] + fc1_units, 0:fc2_units].set(params["w2"])
    buf = buf.at[lay["r3"], 0:fc2_units].set(params["b2"].reshape(-1))
    buf = buf.at[lay["r4"], 0:fc2_units].set(params["w3"].reshape(-1))
    buf = buf.at[lay["r5"], 0].set(params["b3"].reshape(()))
    return buf.astype(jnp.bfloat16)


def critic_forward(state, packed, *, state_size, fc1_units, fc2_units, block_m=2048):
    """state: [B, state_size] float. packed: result of pack_params. -> [B, 1] f32."""
    lay = _layout(state_size, fc1_units, fc2_units)
    w, rows, s_pad = lay["w"], lay["rows"], lay["r1"]

    b = state.shape[0]
    # Choose the tile count first (so padding waste stays < 128 rows per tile),
    # then round the tile to 128 rows for tile-aligned bf16 loads and a fully
    # lane-dense output block. Force >= 2 tiles when worthwhile so v7x's second
    # TensorCore gets work (harmless on v5e/v6e).
    nt = pl.cdiv(b, block_m)
    if nt == 1 and b >= 256:
        nt = 2
    bm = _round_up(pl.cdiv(b, nt), 128)
    nt = pl.cdiv(b, bm)
    b_pad = nt * bm

    if b_pad != b or state.shape[1] != s_pad:
        state = jnp.pad(state, ((0, b_pad - b), (0, s_pad - state.shape[1])))
    state = state.astype(jnp.bfloat16)

    kernel = functools.partial(
        _critic_kernel,
        r1=lay["r1"], r2=lay["r2"], r3=lay["r3"], r4=lay["r4"], r5=lay["r5"])

    out = pl.pallas_call(
        kernel,
        out_shape=jax.ShapeDtypeStruct((nt, 1, bm), jnp.float32),
        grid=(nt,),
        in_specs=[
            # activations stream in batch tiles
            pl.BlockSpec((bm, s_pad), lambda i: (i, 0)),
            # single packed parameter buffer, resident across all batch tiles
            pl.BlockSpec((rows, w), lambda i: (0, 0)),
        ],
        # lane-dense output row per tile -> unmasked stores + contiguous writeback
        out_specs=pl.BlockSpec((1, 1, bm), lambda i: (i, 0, 0)),
        compiler_params=pltpu.CompilerParams(
            dimension_semantics=("parallel",),
            vmem_limit_bytes=48 * 1024 * 1024),
    )(state, packed)
    return out.reshape(b_pad, 1)[:b]


def init_critic_params(key, state_size, fc1_units, fc2_units):
    """Deterministic init mirroring CriticNet.reset_parameters().

    PyTorch's hidden_init uses fan_in = weight.size(0) = out_features (as
    written in the reference code), so lim = 1/sqrt(out_features) for fc1/fc2.
    Biases keep nn.Linear's default U(-1/sqrt(in_features), 1/sqrt(in_features)).
    Weights stored as [in, out].
    """
    k = jax.random.split(key, 6)

    lim1 = 1.0 / np.sqrt(fc1_units)
    lim2 = 1.0 / np.sqrt(fc2_units)
    lim3 = 0.003

    w1 = jax.random.uniform(k[0], (state_size, fc1_units), jnp.float32, -lim1, lim1)
    w2 = jax.random.uniform(k[1], (fc1_units, fc2_units), jnp.float32, -lim2, lim2)
    w3 = jax.random.uniform(k[2], (fc2_units, 1), jnp.float32, -lim3, lim3)

    b1_lim = 1.0 / np.sqrt(state_size)
    b2_lim = 1.0 / np.sqrt(fc1_units)
    b3_lim = 1.0 / np.sqrt(fc2_units)
    b1 = jax.random.uniform(k[3], (1, fc1_units), jnp.float32, -b1_lim, b1_lim)
    b2 = jax.random.uniform(k[4], (1, fc2_units), jnp.float32, -b2_lim, b2_lim)
    b3 = jax.random.uniform(k[5], (1, 1), jnp.float32, -b3_lim, b3_lim)

    return {"w1": w1, "b1": b1, "w2": w2, "b2": b2, "w3": w3, "b3": b3}


if __name__ == "__main__":
    key = jax.random.PRNGKey(0)
    k_param, k_state = jax.random.split(key)

    batch = 8
    state_size = 24
    fc1_units = 64
    fc2_units = 64

    params = init_critic_params(k_param, state_size, fc1_units, fc2_units)
    packed = pack_params(params, state_size, fc1_units, fc2_units)
    state = jax.random.normal(k_state, (batch, state_size), jnp.float32)

    out = critic_forward(state, packed,
                         state_size=state_size,
                         fc1_units=fc1_units,
                         fc2_units=fc2_units)
    out = jax.block_until_ready(out)
    assert out.shape == (batch, 1)

    # Pure-JAX reference of the same forward pass with matched bf16 quantization.
    bf16, f32 = jnp.bfloat16, jnp.float32
    xb = state.astype(bf16)
    w1b, w2b = params["w1"].astype(bf16), params["w2"].astype(bf16)
    w3b = params["w3"].astype(bf16).astype(f32).reshape(1, -1)
    b1b = params["b1"].astype(bf16).astype(f32)
    b2b = params["b2"].astype(bf16).astype(f32)
    b3b = params["b3"].astype(bf16).astype(f32)
    h1 = jnp.maximum(jnp.dot(xb, w1b, preferred_element_type=f32) + b1b, 0.0)
    h2 = jnp.maximum(jnp.dot(h1.astype(bf16), w2b, preferred_element_type=f32) + b2b, 0.0)
    ref = jnp.sum(h2 * w3b, axis=-1, keepdims=True) + b3b

    np.testing.assert_allclose(np.asarray(out), np.asarray(ref), rtol=5e-3, atol=5e-3)
    print("KERNEL_OK")
</pallas_src>

<mosaic_0001>
module attributes {stable_mosaic.version = 11 : i64} {
  func.func @_critic_kernel(%arg0: i32, %arg1: memref<128x32xbf16, #tpu.memory_space<vmem>>, %arg2: memref<224x128xbf16, #tpu.memory_space<vmem>>, %arg3: memref<1x1x128xf32, #tpu.memory_space<vmem>>) attributes {dimension_semantics = [#tpu.dimension_semantics<parallel>], iteration_bounds = array<i64: 1>, scalar_prefetch = 0 : i64, scratch_operands = 0 : i64, tpu.core_type = #tpu.core_type<tc>, window_params = [{transform_indices = @transform_0, window_bounds = array<i64: 128, 32>}, {pipeline_mode = #tpu.pipeline_mode<synchronous>, transform_indices = @transform_1, window_bounds = array<i64: 224, 128>}, {transform_indices = @transform_2, window_bounds = array<i64: 1, 1, 128>}]} {
    %c0 = arith.constant 0 : index
    %c0_0 = arith.constant 0 : index
    %0 = vector.load %arg1[%c0, %c0_0] : memref<128x32xbf16, #tpu.memory_space<vmem>>, vector<128x32xbf16>
    %c0_1 = arith.constant 0 : index
    %c0_2 = arith.constant 0 : index
    %1 = vector.load %arg2[%c0_1, %c0_2] : memref<224x128xbf16, #tpu.memory_space<vmem>>, vector<32x128xbf16>
    %c32 = arith.constant 32 : index
    %c0_3 = arith.constant 0 : index
    %2 = vector.load %arg2[%c32, %c0_3] : memref<224x128xbf16, #tpu.memory_space<vmem>>, vector<1x128xbf16>
    %3 = arith.extf %2 : vector<1x128xbf16> to vector<1x128xf32>
    %c48 = arith.constant 48 : index
    %c0_4 = arith.constant 0 : index
    %4 = vector.load %arg2[%c48, %c0_4] : memref<224x128xbf16, #tpu.memory_space<vmem>>, vector<128x128xbf16>
    %c176 = arith.constant 176 : index
    %c0_5 = arith.constant 0 : index
    %5 = vector.load %arg2[%c176, %c0_5] : memref<224x128xbf16, #tpu.memory_space<vmem>>, vector<1x128xbf16>
    %6 = arith.extf %5 : vector<1x128xbf16> to vector<1x128xf32>
    %c192 = arith.constant 192 : index
    %c0_6 = arith.constant 0 : index
    %7 = vector.load %arg2[%c192, %c0_6] : memref<224x128xbf16, #tpu.memory_space<vmem>>, vector<1x128xbf16>
    %8 = arith.extf %7 : vector<1x128xbf16> to vector<1x128xf32>
    %c208 = arith.constant 208 : index
    %c0_7 = arith.constant 0 : index
    %9 = vector.load %arg2[%c208, %c0_7] : memref<224x128xbf16, #tpu.memory_space<vmem>>, vector<1x1xbf16>
    %10 = arith.extf %9 : vector<1x1xbf16> to vector<1x1xf32>
    %cst = arith.constant dense<0.000000e+00> : vector<128x128xf32>
    %11 = tpu.matmul %0, %1, %cst {dimension_numbers = #tpu.dot_dimension_numbers<[1], [0], [0], [1], [0, 0, 1, 1], [], []>} : vector<128x32xbf16>, vector<32x128xbf16>, vector<128x128xf32> -> vector<128x128xf32>
    %12 = vector.broadcast %3 : vector<1x128xf32> to vector<128x128xf32>
    %13 = arith.addf %11, %12 : vector<128x128xf32>
    %cst_8 = arith.constant 0.000000e+00 : f32
    %14 = vector.broadcast %cst_8 : f32 to vector<128x128xf32>
    %15 = arith.maximumf %13, %14 : vector<128x128xf32>
    %16 = arith.truncf %15 : vector<128x128xf32> to vector<128x128xbf16>
    %cst_9 = arith.constant dense<0.000000e+00> : vector<128x128xf32>
    %17 = tpu.matmul %16, %4, %cst_9 {dimension_numbers = #tpu.dot_dimension_numbers<[1], [0], [0], [1], [0, 0, 1, 1], [], []>} : vector<128x128xbf16>, vector<128x128xbf16>, vector<128x128xf32> -> vector<128x128xf32>
    %18 = vector.broadcast %6 : vector<1x128xf32> to vector<128x128xf32>
    %19 = arith.addf %17, %18 : vector<128x128xf32>
    %cst_10 = arith.constant 0.000000e+00 : f32
    %20 = vector.broadcast %cst_10 : f32 to vector<128x128xf32>
    %21 = arith.maximumf %19, %20 : vector<128x128xf32>
    %22 = vector.broadcast %8 : vector<1x128xf32> to vector<128x128xf32>
    %23 = arith.mulf %21, %22 : vector<128x128xf32>
    %cst_11 = arith.constant dense<0.000000e+00> : vector<128xf32>
    %24 = vector.multi_reduction <add>, %23, %cst_11 [1] : vector<128x128xf32> to vector<128xf32>
    %25 = vector.shape_cast %24 : vector<128xf32> to vector<128x1xf32>
    %26 = vector.broadcast %10 : vector<1x1xf32> to vector<128x1xf32>
    %27 = arith.addf %25, %26 : vector<128x1xf32>
    %28 = vector.shape_cast %27 : vector<128x1xf32> to vector<1x1x128xf32>
    %c0_12 = arith.constant 0 : index
    %c0_13 = arith.constant 0 : index
    %c0_14 = arith.constant 0 : index
    %29 = vector.load %arg3[%c0_12, %c0_13, %c0_14] : memref<1x1x128xf32, #tpu.memory_space<vmem>>, vector<1x1x128xf32>
    tpu.vector_store %arg3[%c0_12, %c0_13, %c0_14], %28 {strides = array<i32>} : memref<1x1x128xf32, #tpu.memory_space<vmem>>, vector<1x1x128xf32>,
    return
  }
  func.func @transform_0(%arg0: i32) -> (i32, i32) {
    %c0_i32 = arith.constant 0 : i32
    %c0_i32_0 = arith.constant 0 : i32
    return %arg0, %c0_i32 : i32, i32
  }
  func.func @transform_1(%arg0: i32) -> (i32, i32) {
    %c0_i32 = arith.constant 0 : i32
    %c0_i32_0 = arith.constant 0 : i32
    %c0_i32_1 = arith.constant 0 : i32
    return %c0_i32, %c0_i32_0 : i32, i32
  }
  func.func @transform_2(%arg0: i32) -> (i32, i32, i32) {
    %c0_i32 = arith.constant 0 : i32
    %c0_i32_0 = arith.constant 0 : i32
    %c0_i32_1 = arith.constant 0 : i32
    return %arg0, %c0_i32, %c0_i32_0 : i32, i32, i32
  }
}

</mosaic_0001>

<bundles_post_ra>
// kernel: tpu_custom_call.1
= control target key start
LH: loop header
LB: loop body
LE: loop exit
PB: predicated region body
PF: predicated region fallthrough
CT: control target
= control target key end

     0   :  { %7 = vsyncpa [#allocation3], 0  ;;  %s1052_s0 = inlined_call_operand.vmem [shape: bf16[128,32], index: 0, kind: input, shape index: {}]   ;;  %s1053_s1 = inlined_call_operand.hbm [shape: bf16[224,128], index: 1, kind: input, shape index: {}]   ;;  %s1054_s2 = inlined_call_operand.hbm [shape: f32[1,1,128], index: 2, kind: output, shape index: {}]  }
   0x1   :  { %8 = vsyncpa [#allocation4], 0  ;;  %s895_s9 = smov [#allocation2]   ;;  %s847_s13 = scalar_lea.hbm %s1053_s1, 1792 }
   0x2   :  { %s16_s10 = sshll.u32 %s895_s9, 4  ;;  %p848_p0 = scmp.ne.s32.totalorder %s1053_s1, %s847_s13  ;;  %s17_s10 = int_to_ptr.vmem [resolvable:$true] %s16_s10 }
   0x3   :  { %p851_p1 = scmp.lt.u32.totalorder %s847_s13, %s1053_s1 }
   0x5   :  { %p853_p2 = pnand %p851_p1, %p848_p0 }
   0x7   :  { %856 = shalt.err (!%p853_p2)
}
   0x8   :  { %s857_s18 = scalar_lea.vmem %s17_s10, 1792  ;;  %p862_p4 = scmp.lt.s32.totalorder %s17_s10, %s17_s10 }
   0x9   :  { %p858_p3 = scmp.ne.s32.totalorder %s17_s10, %s857_s18  ;;  %p863_p5 = scmp.lt.s32.totalorder %s857_s18, %s857_s18 }
   0xb   :  { %p864_p6 = por %p863_p5, %p862_p4 }
   0xd   :  { %p865_p7 = pnand %p864_p6, %p858_p3 }
   0xf   :  { %868 = shalt.err (!%p865_p7)
}
  0x10   :  { %s896_s19 = smov 64   ;;  %s897_s20 = smov 4  }
  0x11   :  { %22 = dma.hbm_to_vmem [thread:$0]  %s1053_s1, 1792, %s17_s10, [#allocation3], %s896_s19, %s896_s19, %s897_s20  }
  0x12   :  { %891 = dma.done.wait [#allocation3], 1792  }
  0x13   :  { %892 = vsyncadd [#allocation3], 4294965504  ;;  %v829_v0 = vld [vmem:[#allocation2] sm:$0xff]   ;;  %v830_v1 = vld [vmem:[#allocation2 + $0x8] sm:$0xff]   ;;  %vm127_vm0 = vcmask 261120   ;;  %v71_v18 = vlaneseq  ;;  %vm585_vm1 = vcmask 130112  }
  0x14   :  { %754 = vmatprep.subr.bf16.mxu0 %v829_v0  ;;  %v831_v2 = vld [vmem:[%s1052_s0] sm:$0xff]   ;;  %v832_v3 = vld [vmem:[%s1052_s0 + $0x8] sm:$0xff]   ;;  %v833_v4 = vld [vmem:[%s1052_s0 + $0x10] sm:$0xff]   ;;  %vm592_vm2 = vcmask 195712   ;;  %vm599_vm3 = vcmask 261312   ;;  %vm606_vm4 = vcmask 326912  }
  0x15   :  { %755 = vmatpush3.bf16.msra.mxu0 %v829_v0  ;;  %758 = vmatprep.mubr.msk.bf16.mxu0 %vm127_vm0, %v831_v2  ;;  %v839_v5 = vld [vmem:[#allocation2 + $0x18] sm:$0xff]   ;;  %v840_v6 = vld [vmem:[#allocation2 + $0x20] sm:$0xff]   ;;  %v841_v8 = vld [vmem:[#allocation2 + $0x28] sm:$0xff]   ;;  %v960_v19 = vshrl.u32 %v71_v18, 7  ;;  %vm613_vm5 = vcmask 392512   ;;  %vm620_vm6 = vcmask 458112  }
  0x16   :  { %756 = vmatprep.subr.bf16.mxu0 %v830_v1  ;;  %806 = vmatprep.subr.bf16.mxu1 %v839_v5  ;;  %v834_v7 = vld [vmem:[%s1052_s0 + $0x18] sm:$0xff]   ;;  %v835_v9 = vld [vmem:[%s1052_s0 + $0x20] sm:$0xff]   ;;  %v842_v10 = vld [vmem:[#allocation2 + $0x30] sm:$0xff]   ;;  %vm627_vm7 = vcmask 523712   ;;  %vm634_vm8 = vcmask 589312   ;;  %vm641_vm9 = vcmask 654912  }
  0x17   :  { %814 = vmatpush3.bf16.msra.mxu1 %v839_v5  ;;  %v836_v11 = vld [vmem:[%s1052_s0 + $0x28] sm:$0xff]   ;;  %v843_v12 = vld [vmem:[#allocation2 + $0x38] sm:$0xff]   ;;  %v837_v13 = vld [vmem:[%s1052_s0 + $0x30] sm:$0xff]   ;;  %v963_v22 = vsub.s32 0, %v960_v19  ;;  %vm648_vm10 = vcmask 720512   ;;  %vm655_vm11 = vcmask 786112  }
  0x18   :  { %807 = vmatprep.subr.bf16.mxu1 %v840_v6  ;;  %v844_v14 = vld [vmem:[#allocation2 + $0x40] sm:$0xff]   ;;  %v838_v15 = vld [vmem:[%s1052_s0 + $0x38] sm:$0xff]   ;;  %v845_v16 = vld [vmem:[#allocation2 + $0x48] sm:$0xff]   ;;  %vm662_vm12 = vcmask 851712   ;;  %vm669_vm13 = vcmask 917312   ;;  %vm676_vm14 = vcmask 982912  }
  0x19   :  { %757 = vmatpush3.bf16.msra.mxu0 %v830_v1  ;;  %v846_v17 = vld [vmem:[#allocation2 + $0x50] sm:$0xff]   ;;  %s899_s0 = smov [#allocation5]   ;;  %vm683_vm15 = vcmask 1048512  }
  0x1a   :  { %774 = vmatprep.subr.bf16.mxu0 %v839_v5  ;;  %v47_v20 = vld [vmem:[#allocation2 + $0x10] sm:$0x1]  ;;  %s693_s10 = sshll.u32 %s899_s0, 4  ;;  %s694_s10 = int_to_ptr.vmem [resolvable:$true] %s693_s10 }
  0x1b   :  { %815 = vmatpush3.bf16.msra.mxu1 %v840_v6  ;;  %v48_v21 = vunpack.c.l.bf16 %v47_v20  ;;  %v67_v20 = vld [vmem:[#allocation2 + $0x60] sm:$0x1]  ;;  %s869_s11 = scalar_lea.vmem %s694_s10, 16  ;;  %s873_s12 = scalar_lea.vmem %s694_s10, 32 }
  0x1c   :  { %759 = vmatmul.mubr.msk.bf16.vlgmr.msra.gmra.mrb[0].mxu0 %vm127_vm0, %v832_v3  ;;  %808 = vmatprep.subr.bf16.mxu1 %v841_v8  ;;  %p870_p8 = scmp.ne.s32.totalorder %s694_s10, %s869_s11  ;;  %p874_p9 = scmp.lt.s32.totalorder %s694_s10, %s694_s10 }
  0x1d   :  { %762 = vmatprep.mubr.msk.bf16.mxu0 %vm127_vm0, %v833_v4  ;;  %775 = vmatpush3.bf16.msra.mxu0 %v839_v5  ;;  %v74_v23 = vrot.slane %v48_v21, %v963_v22  ;;  %p875_p10 = scmp.lt.s32.totalorder %s873_s12, %s869_s11 }
  0x1e   :  { %776 = vmatprep.subr.bf16.mxu0 %v840_v6 }
  0x1f   :  { %816 = vmatpush3.bf16.msra.mxu1 %v841_v8  ;;  %p876_p11 = por %p875_p10, %p874_p9 }
  0x20   :  { %809 = vmatprep.subr.bf16.mxu1 %v842_v10 }
  0x21   :  { %777 = vmatpush3.bf16.msra.mxu0 %v840_v6  ;;  %p877_p12 = pnand %p876_p11, %p870_p8 }
  0x22   :  { %778 = vmatprep.subr.bf16.mxu0 %v841_v8 }
  0x23   :  { %817 = vmatpush3.bf16.msra.mxu1 %v842_v10 }
  0x24   :  { %763 = vmatmul.mubr.msk.bf16.gmra.mrb[4].mxu0 %vm127_vm0, %v834_v7  ;;  %810 = vmatprep.subr.bf16.mxu1 %v843_v12 }
  0x25   :  { %766 = vmatprep.mubr.msk.bf16.mxu0 %vm127_vm0, %v835_v9  ;;  %779 = vmatpush3.bf16.msra.mxu0 %v841_v8 }
  0x26   :  { %780 = vmatprep.subr.bf16.mxu0 %v842_v10 }
  0x27   :  { %818 = vmatpush3.bf16.msra.mxu1 %v843_v12 }
  0x28   :  { %811 = vmatprep.subr.bf16.mxu1 %v844_v14 }
  0x29   :  { %781 = vmatpush3.bf16.msra.mxu0 %v842_v10 }
  0x2a   :  { %782 = vmatprep.subr.bf16.mxu0 %v843_v12 }
  0x2b   :  { %819 = vmatpush3.bf16.msra.mxu1 %v844_v14 }
  0x2c   :  { %767 = vmatmul.mubr.msk.bf16.gmra.mrb[8].mxu0 %vm127_vm0, %v836_v11  ;;  %812 = vmatprep.subr.bf16.mxu1 %v845_v16 }
  0x2d   :  { %770 = vmatprep.mubr.msk.bf16.mxu0 %vm127_vm0, %v837_v13  ;;  %783 = vmatpush3.bf16.msra.mxu0 %v843_v12 }
  0x2e   :  { %784 = vmatprep.subr.bf16.mxu0 %v844_v14 }
  0x2f   :  { %820 = vmatpush3.bf16.msra.mxu1 %v845_v16 }
  0x30   :  { %813 = vmatprep.subr.bf16.mxu1 %v846_v17 }
  0x31   :  { %785 = vmatpush3.bf16.msra.mxu0 %v844_v14 }
  0x32   :  { %786 = vmatprep.subr.bf16.mxu0 %v845_v16 }
  0x33   :  { %821 = vmatpush3.bf16.msra.mxu1 %v846_v17 }
  0x34   :  { %771 = vmatmul.mubr.msk.bf16.gmra.mrb[12].mxu0 %vm127_vm0, %v838_v15 }
  0x35   :  { %787 = vmatpush3.bf16.msra.mxu0 %v845_v16  ;;  %v65_v16 = vld [vmem:[#allocation2 + $0x58] sm:$0x1] }
  0x36   :  { %788 = vmatprep.subr.bf16.mxu0 %v846_v17 }
  0x39   :  { %789 = vmatpush3.bf16.msra.mxu0 %v846_v17  ;;  %v66_v17 = vunpack.c.l.bf16 %v65_v16 }
  0x3b   :  { %v967_v21 = vrot.slane %v66_v17, %v963_v22 }
  0xef   :  { %v760_v24 = vpop.f32.mrb[0].mxu0 }
  0xf0   :  { %v195_v25 = vadd.f32 %v760_v24, %v74_v23  ;;  %v186_v26 = vpop.f32.mrb[1].mxu0  ;;  %v68_v24 = vunpack.c.l.bf16 %v67_v20 }
  0xf1   :  { %v187_v27 = vadd.f32 %v186_v26, %v74_v23  ;;  %v761_v28 = vpop.f32.mrb[2].mxu0 }
  0xf2   :  { %v198_v29 = vadd.f32 %v761_v28, %v74_v23  ;;  %v189_v30 = vpop.f32.mrb[3].mxu0  ;;  %v251_v32 = vmax.f32 %v195_v25, 0.0  ;;  %v971_v28 = vrot.slane %v68_v24, %v963_v22 }
  0xf3   :  { %v190_v31 = vadd.f32 %v189_v30, %v74_v23  ;;  %v249_v34 = vmax.f32 %v187_v27, 0.0 }
  0xf4   :  { %v252_v33 = vmax.f32 %v198_v29, 0.0 }
  0xf5   :  { %v250_v35 = vmax.f32 %v190_v31, 0.0 }
  0xf6   :  { %v266_v36 = vpack.c.bf16 %v252_v33, %v251_v32 }
  0xf7   :  { %v265_v37 = vpack.c.bf16 %v250_v35, %v249_v34  ;;  %v764_v38 = vpop.f32.mrb[4].mxu0 }
  0xf8   :  { %v211_v39 = vadd.f32 %v764_v38, %v74_v23  ;;  %v202_v40 = vpop.f32.mrb[5].mxu0 }
  0xf9   :  { %v203_v41 = vadd.f32 %v202_v40, %v74_v23  ;;  %v765_v42 = vpop.f32.mrb[6].mxu0  ;;  %790 = vmatprep.mubr.bf16.mxu0 %v265_v37 }
  0xfa   :  { %v255_v43 = vmax.f32 %v211_v39, 0.0  ;;  %v214_v44 = vadd.f32 %v765_v42, %v74_v23  ;;  %v205_v45 = vpop.f32.mrb[7].mxu0  ;;  %791 = vmatmul.mubr.bf16.vlgmr.msra.gmra.mrb[16].mxu0 %v266_v36 }
  0xfb   :  { %v253_v46 = vmax.f32 %v203_v41, 0.0  ;;  %v206_v47 = vadd.f32 %v205_v45, %v74_v23 }
  0xfc   :  { %v256_v48 = vmax.f32 %v214_v44, 0.0 }
  0xfd   :  { %v254_v49 = vmax.f32 %v206_v47, 0.0 }
  0xfe   :  { %v268_v50 = vpack.c.bf16 %v256_v48, %v255_v43 }
  0xff   :  { %v768_v51 = vpop.f32.mrb[8].mxu0  ;;  %v267_v52 = vpack.c.bf16 %v254_v49, %v253_v46 }
 0x100   :  { %v227_v53 = vadd.f32 %v768_v51, %v74_v23  ;;  %v218_v54 = vpop.f32.mrb[9].mxu0 }
 0x101   :  { %v219_v55 = vadd.f32 %v218_v54, %v74_v23  ;;  %v769_v56 = vpop.f32.mrb[10].mxu0  ;;  %794 = vmatprep.mubr.bf16.mxu1 %v267_v52 }
 0x102   :  { %v259_v57 = vmax.f32 %v227_v53, 0.0  ;;  %v230_v58 = vadd.f32 %v769_v56, %v74_v23  ;;  %v221_v59 = vpop.f32.mrb[11].mxu0  ;;  %795 = vmatmul.mubr.bf16.vlgmr.msra.gmra.mrb[0].mxu1 %v268_v50 }
 0x103   :  { %v257_v60 = vmax.f32 %v219_v55, 0.0  ;;  %v222_v61 = vadd.f32 %v221_v59, %v74_v23 }
 0x104   :  { %v260_v62 = vmax.f32 %v230_v58, 0.0 }
 0x105   :  { %v258_v63 = vmax.f32 %v222_v61, 0.0 }
 0x106   :  { %v270_v0 = vpack.c.bf16 %v260_v62, %v259_v57 }
 0x107   :  { %v269_v1 = vpack.c.bf16 %v258_v63, %v257_v60  ;;  %v772_v2 = vpop.f32.mrb[12].mxu0 }
 0x108   :  { %v243_v3 = vadd.f32 %v772_v2, %v74_v23  ;;  %v234_v4 = vpop.f32.mrb[13].mxu0 }
 0x109   :  { %v235_v5 = vadd.f32 %v234_v4, %v74_v23  ;;  %v773_v6 = vpop.f32.mrb[14].mxu0  ;;  %798 = vmatprep.mubr.bf16.mxu1 %v269_v1 }
 0x10a   :  { %v263_v7 = vmax.f32 %v243_v3, 0.0  ;;  %v246_v8 = vadd.f32 %v773_v6, %v74_v23  ;;  %v237_v9 = vpop.f32.mrb[15].mxu0  ;;  %799 = vmatmul.mubr.bf16.gmra.mrb[4].mxu1 %v270_v0 }
 0x10b   :  { %v261_v10 = vmax.f32 %v235_v5, 0.0  ;;  %v238_v11 = vadd.f32 %v237_v9, %v74_v23  ;;  %v898_v5 = vmov 0  }
 0x10c   :  { %v264_v12 = vmax.f32 %v246_v8, 0.0  ;;  %827 = vset.pattern.permute.xlu1 %v898_v5  ;;  %828 = vset.pattern.permute.xlu0 %v898_v5 }
 0x10d   :  { %v262_v13 = vmax.f32 %v238_v11, 0.0 }
 0x10e   :  { %v272_v14 = vpack.c.bf16 %v264_v12, %v263_v7 }
 0x10f   :  { %v271_v15 = vpack.c.bf16 %v262_v13, %v261_v10 }
 0x111   :  { %802 = vmatprep.mubr.bf16.mxu1 %v271_v15 }
 0x112   :  { %803 = vmatmul.mubr.bf16.gmra.mrb[8].mxu1 %v272_v14 }
 0x1cd   :  { %v792_v25 = vpop.f32.mrb[16].mxu0 }
 0x1ce   :  { %v368_v26 = vadd.f32 %v792_v25, %v967_v21  ;;  %v359_v27 = vpop.f32.mrb[17].mxu0 }
 0x1cf   :  { %v360_v23 = vadd.f32 %v359_v27, %v967_v21  ;;  %v793_v29 = vpop.f32.mrb[18].mxu0 }
 0x1d0   :  { %v424_v30 = vmax.f32 %v368_v26, 0.0  ;;  %v371_v31 = vadd.f32 %v793_v29, %v967_v21  ;;  %v362_v32 = vpop.f32.mrb[19].mxu0 }
 0x1d1   :  { %v422_v33 = vmax.f32 %v360_v23, 0.0  ;;  %v363_v34 = vadd.f32 %v362_v32, %v967_v21 }
 0x1d2   :  { %v425_v35 = vmax.f32 %v371_v31, 0.0  ;;  %v444_v36 = vmul.f32 %v971_v28, %v424_v30  ;;  %v69_v31 = vld [vmem:[#allocation2 + $0x68] sm:$0x1] }
 0x1d3   :  { %v423_v37 = vmax.f32 %v363_v34, 0.0  ;;  %v442_v38 = vmul.f32 %v971_v28, %v422_v33  ;;  %v70_v32 = vunpack.c.l.bf16 %v69_v31 }
 0x1d4   :  { %462 = vadd.xlane.f32.xlu1 %v444_v36  ;;  %v445_v42 = vmul.f32 %v971_v28, %v425_v35 }
 0x1d5   :  { %v796_v39 = vpop.f32.mrb[0].mxu1  ;;  %458 = vadd.xlane.f32.xlu0 %v442_v38  ;;  %v443_v45 = vmul.f32 %v971_v28, %v423_v37 }
 0x1d6   :  { %v384_v40 = vadd.f32 %v796_v39, %v967_v21  ;;  %v375_v41 = vpop.f32.mrb[1].mxu1 }
 0x1d7   :  { %v376_v43 = vadd.f32 %v375_v41, %v967_v21  ;;  %v797_v44 = vpop.f32.mrb[2].mxu1 }
 0x1d8   :  { %v428_v46 = vmax.f32 %v384_v40, 0.0  ;;  %v387_v47 = vadd.f32 %v797_v44, %v967_v21  ;;  %v378_v48 = vpop.f32.mrb[3].mxu1  ;;  %464 = vadd.xlane.f32.xlu1 %v445_v42 }
 0x1d9   :  { %v379_v49 = vadd.f32 %v378_v48, %v967_v21  ;;  %460 = vadd.xlane.f32.xlu0 %v443_v45  ;;  %v426_v52 = vmax.f32 %v376_v43, 0.0 }
 0x1da   :  { %v429_v50 = vmax.f32 %v387_v47, 0.0  ;;  %v448_v51 = vmul.f32 %v971_v28, %v428_v46 }
 0x1db   :  { %v427_v53 = vmax.f32 %v379_v49, 0.0  ;;  %v446_v60 = vmul.f32 %v971_v28, %v426_v52 }
 0x1dc   :  { %v449_v54 = vmul.f32 %v971_v28, %v429_v50 }
 0x1dd   :  { %v800_v55 = vpop.f32.mrb[4].mxu1  ;;  %470 = vadd.xlane.f32.xlu0 %v448_v51  ;;  %v447_v0 = vmul.f32 %v971_v28, %v427_v53 }
 0x1de   :  { %v400_v56 = vadd.f32 %v800_v55, %v967_v21  ;;  %v391_v57 = vpop.f32.mrb[5].mxu1  ;;  %472 = vadd.xlane.f32.xlu1 %v449_v54 }
 0x1df   :  { %v392_v58 = vadd.f32 %v391_v57, %v967_v21  ;;  %v801_v59 = vpop.f32.mrb[6].mxu1 }
 0x1e0   :  { %v432_v61 = vmax.f32 %v400_v56, 0.0  ;;  %v403_v62 = vadd.f32 %v801_v59, %v967_v21  ;;  %v394_v63 = vpop.f32.mrb[7].mxu1 }
 0x1e1   :  { %v395_v1 = vadd.f32 %v394_v63, %v967_v21  ;;  %466 = vadd.xlane.f32.xlu0 %v446_v60  ;;  %v430_v4 = vmax.f32 %v392_v58, 0.0 }
 0x1e2   :  { %v433_v2 = vmax.f32 %v403_v62, 0.0  ;;  %468 = vadd.xlane.f32.xlu1 %v447_v0  ;;  %v452_v3 = vmul.f32 %v971_v28, %v432_v61 }
 0x1e3   :  { %v431_v6 = vmax.f32 %v395_v1, 0.0  ;;  %v450_v13 = vmul.f32 %v971_v28, %v430_v4  ;;  %v1006_v1 = vand.u32 127, %v71_v18 }
 0x1e4   :  { %v453_v7 = vmul.f32 %v971_v28, %v433_v2 }
 0x1e5   :  { %v804_v8 = vpop.f32.mrb[8].mxu1  ;;  %478 = vadd.xlane.f32.xlu0 %v452_v3  ;;  %v451_v16 = vmul.f32 %v971_v28, %v431_v6  ;;  %v580_v2 = vadd.s32 4294967288, %v1006_v1  ;;  %v587_v6 = vadd.s32 4294967280, %v1006_v1  ;;  %v622_v31 = vadd.s32 4294967240, %v1006_v1 }
 0x1e6   :  { %v407_v9 = vpop.f32.mrb[9].mxu1  ;;  %480 = vadd.xlane.f32.xlu1 %v453_v7  ;;  %v416_v10 = vadd.f32 %v804_v8, %v967_v21  ;;  %v578_v7 = vsub.s32 %v1006_v1, %v960_v19 }
 0x1e7   :  { %v408_v11 = vadd.f32 %v407_v9, %v967_v21  ;;  %v805_v12 = vpop.f32.mrb[10].mxu1  ;;  %v583_v4 = vsub.s32 %v580_v2, %v960_v19  ;;  %v601_v9 = vadd.s32 4294967264, %v1006_v1  ;;  %v590_v18 = vsub.s32 %v587_v6, %v960_v19 }
 0x1e8   :  { %v419_v14 = vadd.f32 %v805_v12, %v967_v21  ;;  %v410_v15 = vpop.f32.mrb[11].mxu1  ;;  %v436_v25 = vmax.f32 %v416_v10, 0.0  ;;  %v594_v10 = vadd.s32 4294967272, %v1006_v1 }
 0x1e9   :  { %v434_v17 = vmax.f32 %v408_v11, 0.0  ;;  %v411_v20 = vadd.f32 %v410_v15, %v967_v21  ;;  %474 = vadd.xlane.f32.xlu0 %v450_v13  ;;  %v493_v21 = vrot.slane %v70_v32, %v963_v22  ;;  %v608_v13 = vadd.s32 4294967256, %v1006_v1 }
 0x1ea   :  { %v437_v24 = vmax.f32 %v419_v14, 0.0  ;;  %476 = vadd.xlane.f32.xlu1 %v451_v16  ;;  %v456_v29 = vmul.f32 %v971_v28, %v436_v25  ;;  %v604_v15 = vsub.s32 %v601_v9, %v960_v19  ;;  %v597_v16 = vsub.s32 %v594_v10, %v960_v19 }
 0x1eb   :  { %v454_v26 = vmul.f32 %v971_v28, %v434_v17  ;;  %v435_v27 = vmax.f32 %v411_v20, 0.0  ;;  %v615_v25 = vadd.s32 4294967248, %v1006_v1 }
 0x1ec   :  { %v457_v23 = vmul.f32 %v971_v28, %v437_v24 }
 0x1ed   :  { %482 = vadd.xlane.f32.xlu0 %v454_v26  ;;  %v455_v30 = vmul.f32 %v971_v28, %v435_v27  ;;  %v611_v26 = vsub.s32 %v608_v13, %v960_v19 }
 0x1ee   :  { %488 = vadd.xlane.f32.xlu1 %v457_v23 }
 0x1f1   :  { %486 = vadd.xlane.f32.xlu0 %v456_v29 }
 0x1f2   :  { %484 = vadd.xlane.f32.xlu1 %v455_v30 }
 0x261   :  { %v463_v33 = vpop.xlane.xlu1 %462 }
 0x262   :  { %v496_v34 = vadd.f32 %v493_v21, %v463_v33  ;;  %v459_v35 = vpop.xlane.xlu0 %458 }
 0x263   :  { %v494_v36 = vadd.f32 %v493_v21, %v459_v35 }
 0x264   :  { %533 = vperm.xlu1 %827, %v496_v34   ;;  %v629_v34 = vadd.s32 4294967232, %v1006_v1 }
 0x265   :  { %v465_v37 = vpop.xlane.xlu1 %464  ;;  %527 = vperm.xlu0 %828, %v494_v36   ;;  %v636_v36 = vadd.s32 4294967224, %v1006_v1 }
 0x266   :  { %v497_v38 = vadd.f32 %v493_v21, %v465_v37  ;;  %v461_v39 = vpop.xlane.xlu0 %460 }
 0x267   :  { %v495_v40 = vadd.f32 %v493_v21, %v461_v39  ;;  %v650_v39 = vadd.s32 4294967208, %v1006_v1 }
 0x268   :  { %536 = vperm.xlu1 %827, %v497_v38   ;;  %v643_v38 = vadd.s32 4294967216, %v1006_v1 }
 0x26a   :  { %v471_v41 = vpop.xlane.xlu0 %470 }
 0x26b   :  { %v473_v42 = vpop.xlane.xlu1 %472  ;;  %v500_v28 = vadd.f32 %v493_v21, %v471_v41 }
 0x26c   :  { %530 = vperm.xlu1 %827, %v495_v40   ;;  %v501_v48 = vadd.f32 %v493_v21, %v473_v42  ;;  %v625_v40 = vsub.s32 %v622_v31, %v960_v19 }
 0x26e   :  { %v467_v43 = vpop.xlane.xlu0 %466 }
 0x26f   :  { %v469_v44 = vpop.xlane.xlu1 %468  ;;  %v498_v45 = vadd.f32 %v493_v21, %v467_v43 }
 0x270   :  { %545 = vperm.xlu1 %827, %v500_v28   ;;  %v499_v51 = vadd.f32 %v493_v21, %v469_v44  ;;  %v632_v44 = vsub.s32 %v629_v34, %v960_v19 }
 0x272   :  { %v479_v47 = vpop.xlane.xlu0 %478 }
 0x273   :  { %v481_v22 = vpop.xlane.xlu1 %480  ;;  %v504_v54 = vadd.f32 %v493_v21, %v479_v47  ;;  %v646_v47 = vsub.s32 %v643_v38, %v960_v19 }
 0x274   :  { %v505_v46 = vadd.f32 %v493_v21, %v481_v22  ;;  %539 = vperm.xlu1 %827, %v498_v45   ;;  %v657_v45 = vadd.s32 4294967200, %v1006_v1  ;;  %v639_v22 = vsub.s32 %v636_v36, %v960_v19 }
 0x276   :  { %560 = vperm.xlu0 %828, %v505_v46   ;;  %v475_v52 = vpop.xlane.xlu0 %474 }
 0x277   :  { %v477_v49 = vpop.xlane.xlu1 %476  ;;  %v502_v58 = vadd.f32 %v493_v21, %v475_v52 }
 0x278   :  { %v503_v50 = vadd.f32 %v493_v21, %v477_v49  ;;  %548 = vperm.xlu1 %827, %v501_v48   ;;  %v653_v48 = vsub.s32 %v650_v39, %v960_v19 }
 0x27a   :  { %554 = vperm.xlu0 %828, %v503_v50   ;;  %v483_v57 = vpop.xlane.xlu0 %482  ;;  %v664_v50 = vadd.s32 4294967192, %v1006_v1 }
 0x27b   :  { %v489_v53 = vpop.xlane.xlu1 %488  ;;  %v506_v60 = vadd.f32 %v493_v21, %v483_v57 }
 0x27c   :  { %542 = vperm.xlu1 %827, %v499_v51   ;;  %v509_v59 = vadd.f32 %v493_v21, %v489_v53 }
 0x27e   :  { %v487_v61 = vpop.xlane.xlu0 %486 }
 0x27f   :  { %v485_v55 = vpop.xlane.xlu1 %484  ;;  %v508_v62 = vadd.f32 %v493_v21, %v487_v61 }
 0x280   :  { %v507_v56 = vadd.f32 %v493_v21, %v485_v55  ;;  %557 = vperm.xlu1 %827, %v504_v54   ;;  %v618_v21 = vsub.s32 %v615_v25, %v960_v19  ;;  %v660_v54 = vsub.s32 %v657_v45, %v960_v19  ;;  %v671_v55 = vadd.s32 4294967184, %v1006_v1 }
 0x282   :  { %566 = vperm.xlu0 %828, %v507_v56  }
 0x284   :  { %551 = vperm.xlu1 %827, %v502_v58   ;;  %v678_v58 = vadd.s32 4294967176, %v1006_v1 }
 0x286   :  { %572 = vperm.xlu0 %828, %v509_v59  }
 0x288   :  { %563 = vperm.xlu1 %827, %v506_v60  }
 0x28c   :  { %569 = vperm.xlu1 %827, %v508_v62   ;;  %v667_v62 = vsub.s32 %v664_v50, %v960_v19 }
 0x2e3   :  { %v534_v63 = vpop.permute.xlu1 %533 }
 0x2e4   :  { %v528_v8 = vpop.permute.xlu0 %527  ;;  %v591_v24 = vrot.slane %v534_v63, %v590_v18 }
 0x2e5   :  { %v579_v14 = vrot.slane %v528_v8, %v578_v7 }
 0x2e7   :  { %v537_v0 = vpop.permute.xlu1 %536 }
 0x2e8   :  { %v598_v30 = vrot.slane %v537_v0, %v597_v16 }
 0x2eb   :  { %v531_v3 = vpop.permute.xlu1 %530 }
 0x2ec   :  { %v584_v11 = vrot.slane %v531_v3, %v583_v4  ;;  %v674_v4 = vsub.s32 %v671_v55, %v960_v19 }
 0x2ee   :  { %v586_v17 = vsel %vm585_vm1, %v584_v11, %v579_v14 }
 0x2ef   :  { %v546_v5 = vpop.permute.xlu1 %545  ;;  %v593_v27 = vsel %vm592_vm2, %v591_v24, %v586_v17 }
 0x2f0   :  { %v600_v35 = vsel %vm599_vm3, %v598_v30, %v593_v27  ;;  %v619_v28 = vrot.slane %v546_v5, %v618_v21  ;;  %v681_v5 = vsub.s32 %v678_v58, %v960_v19 }
 0x2f3   :  { %v540_v12 = vpop.permute.xlu1 %539 }
 0x2f4   :  { %v605_v23 = vrot.slane %v540_v12, %v604_v15 }
 0x2f5   :  { %v561_v29 = vpop.permute.xlu0 %560 }
 0x2f6   :  { %v607_v37 = vsel %vm606_vm4, %v605_v23, %v600_v35  ;;  %v654_v61 = vrot.slane %v561_v29, %v653_v48 }
 0x2f7   :  { %v549_v20 = vpop.permute.xlu1 %548 }
 0x2f8   :  { %v626_v49 = vrot.slane %v549_v20, %v625_v40 }
 0x2f9   :  { %v555_v43 = vpop.permute.xlu0 %554 }
 0x2fa   :  { %v640_v56 = vrot.slane %v555_v43, %v639_v22 }
 0x2fb   :  { %v543_v32 = vpop.permute.xlu1 %542 }
 0x2fc   :  { %v612_v33 = vrot.slane %v543_v32, %v611_v26 }
 0x2fe   :  { %v614_v41 = vsel %vm613_vm5, %v612_v33, %v607_v37 }
 0x2ff   :  { %v558_v42 = vpop.permute.xlu1 %557  ;;  %v621_v46 = vsel %vm620_vm6, %v619_v28, %v614_v41 }
 0x300   :  { %v628_v57 = vsel %vm627_vm7, %v626_v49, %v621_v46  ;;  %v647_v59 = vrot.slane %v558_v42, %v646_v47 }
 0x301   :  { %v567_v52 = vpop.permute.xlu0 %566 }
 0x302   :  { %v668_v1 = vrot.slane %v567_v52, %v667_v62 }
 0x303   :  { %v552_v51 = vpop.permute.xlu1 %551 }
 0x304   :  { %v633_v53 = vrot.slane %v552_v51, %v632_v44 }
 0x305   :  { %v573_v7 = vpop.permute.xlu0 %572 }
 0x306   :  { %v635_v60 = vsel %vm634_vm8, %v633_v53, %v628_v57  ;;  %v682_v11 = vrot.slane %v573_v7, %v681_v5 }
 0x307   :  { %v642_v63 = vsel %vm641_vm9, %v640_v56, %v635_v60  ;;  %v564_v0 = vpop.permute.xlu1 %563 }
 0x308   :  { %v649_v2 = vsel %vm648_vm10, %v647_v59, %v642_v63  ;;  %v661_v3 = vrot.slane %v564_v0, %v660_v54 }
 0x309   :  { %v656_v6 = vsel %vm655_vm11, %v654_v61, %v649_v2 }
 0x30a   :  { %v663_v8 = vsel %vm662_vm12, %v661_v3, %v656_v6 }
 0x30b   :  { %v570_v9 = vpop.permute.xlu1 %569  ;;  %v670_v12 = vsel %vm669_vm13, %v668_v1, %v663_v8 }
 0x30c   :  { %v675_v10 = vrot.slane %v570_v9, %v674_v4 }
 0x30e   :  { %v677_v18 = vsel %vm676_vm14, %v675_v10, %v670_v12 }
 0x30f   :  { %v684_v13 = vsel %vm683_vm15, %v682_v11, %v677_v18 }
 0x310   :  { %686 = vst [vmem:[#allocation5] sm:$0x1] %v684_v13 }
 0x311   :  { %880 = shalt.err (!%p877_p12)
}
 0x312   :  { %s881_s15 = scalar_lea.hbm %s1054_s2, 16 }
 0x313   :  { %p882_p13 = scmp.ne.s32.totalorder %s1054_s2, %s881_s15  ;;  %p885_p0 = scmp.lt.u32.totalorder %s881_s15, %s1054_s2 }
 0x315   :  { %p887_p1 = pnand %p885_p0, %p882_p13 }
 0x317   :  { %890 = shalt.err (!%p887_p1)
}
 0x318   :  { %696 = dma.vmem_to_hbm [thread:$0]  %s694_s10, 16, %s1054_s2, [#allocation4]  }
 0x319   :  { %893 = dma.done.wait [#allocation4], 16  }
 0x31a   :  { %894 = vsyncadd [#allocation4], 4294967280 }
 0x31b   :  { %700 = vsyncpa [#allocation3], 1 }
 0x31c   :  { %701 = vsyncpa [#allocation4], 1 }

</bundles_post_ra>
